<compile_context>
chip_gen: v7x
topology: tpu7x:2x2x1
jax: 0.10.0
libtpu: 0.0.40
codegen_flags: <defaults>
</compile_context>

<pallas_src>
import functools

import jax
import jax.numpy as jnp
from jax.experimental import pallas as pl
from jax.experimental.pallas import tpu as pltpu

LANES = 128
SUBLANES = 8


def _round_up(n, m):
  return (n + m - 1) // m * m


def _sigmoid_lr_kernel(x_ref, p_ref, o_ref, *, in_features, hidden_dim):
  """Fused linear1 -> sigmoid -> linear2 on one lane-dense batch tile.

  x_ref: (TB, 128) f32, lanes [0, in_features) real, rest zero.
  p_ref: (rows_p, 128) f32 parameter slab:
           rows [0, in_features)                      : w1 rows  (lane-dense over hidden)
           row  in_features                           : b1
           rows [in_features+1, in_features+1+hidden) : w2 rows  (lane-dense over out)
           row  in_features+1+hidden                  : b2
  o_ref: (TB, 128) f32, lanes [0, out_features) real, rest zero.
  """
  x = x_ref[...]  # (TB, 128) f32

  b1_row = in_features
  w2_row0 = in_features + 1
  b2_row = in_features + 1 + hidden_dim

  # ---- linear1: tiny-K contraction as VPU FMAs (no MXU round-trip) ----
  h = x[:, 0:1] * p_ref[0:1, :] + p_ref[b1_row:b1_row + 1, :]
  for j in range(1, in_features):
    h = h + x[:, j:j + 1] * p_ref[j:j + 1, :]

  # ---- sigmoid (exp on EUP); padded lanes become 0.5 but their w2 rows are
  # never read and padded w2 lanes are zero, so they cannot leak into output.
  h = 1.0 / (1.0 + jnp.exp(-h))

  # ---- linear2: contract only over the real hidden lanes ----
  out = h[:, 0:1] * p_ref[w2_row0:w2_row0 + 1, :] + p_ref[b2_row:b2_row + 1, :]
  for j in range(1, hidden_dim):
    out = out + h[:, j:j + 1] * p_ref[w2_row0 + j:w2_row0 + j + 1, :]

  o_ref[...] = out  # unmasked, lane-dense store


def pack_params(w1, b1, w2, b2):
  """Pack SigmoidLR params into one lane-dense (rows_p, 128) f32 slab.

  w1: (in_features, hidden_dim)   (transpose of PyTorch's (out, in) layout)
  b1: (hidden_dim,)
  w2: (hidden_dim, out_features)
  b2: (out_features,)
  """
  in_features, hidden_dim = w1.shape
  out_features = w2.shape[1]
  # TODO(synk): current packing assumes hidden_dim <= 128 and out_features <= 128;
  # larger widths need multi-slab / lane-tiled packing.
  assert hidden_dim <= LANES and out_features <= LANES and in_features <= LANES

  rows = in_features + 1 + hidden_dim + 1
  rows_p = _round_up(rows, SUBLANES)
  slab = jnp.zeros((rows_p, LANES), jnp.float32)
  slab = slab.at[:in_features, :hidden_dim].set(w1.astype(jnp.float32))
  slab = slab.at[in_features, :hidden_dim].set(b1.astype(jnp.float32))
  slab = slab.at[in_features + 1:in_features + 1 + hidden_dim,
                 :out_features].set(w2.astype(jnp.float32))
  slab = slab.at[in_features + 1 + hidden_dim, :out_features].set(
      b2.astype(jnp.float32))
  return slab


def sigmoid_lr(x, param_slab, *, in_features, hidden_dim, out_features,
               batch_tile=512):
  """Pallas forward of SigmoidLR.  x: (B, in_features) f32."""
  B = x.shape[0]
  rows_p = param_slab.shape[0]

  # Batch tiling: whole (small) batch in one tile; multiples of 8 rows otherwise.
  tb = _round_up(min(batch_tile, _round_up(B, SUBLANES)), SUBLANES)
  Bp = _round_up(B, tb)

  # Lane-dense, zero-padded input slab.
  x_pad = jnp.zeros((Bp, LANES), jnp.float32)
  x_pad = x_pad.at[:B, :in_features].set(x.astype(jnp.float32))

  kernel = functools.partial(_sigmoid_lr_kernel,
                             in_features=in_features, hidden_dim=hidden_dim)

  out_pad = pl.pallas_call(
      kernel,
      out_shape=jax.ShapeDtypeStruct((Bp, LANES), jnp.float32),
      grid=(Bp // tb,),
      in_specs=[
          pl.BlockSpec((tb, LANES), lambda i: (i, 0)),
          pl.BlockSpec((rows_p, LANES), lambda i: (0, 0)),
      ],
      out_specs=pl.BlockSpec((tb, LANES), lambda i: (i, 0)),
      compiler_params=pltpu.CompilerParams(
          dimension_semantics=("parallel",),
          vmem_limit_bytes=32 * 1024 * 1024,  # v7x-safe budget (64 MiB phys)
      ),
  )(x_pad, param_slab)

  return out_pad[:B, :out_features]


def reference(x, w1, b1, w2, b2):
  """Plain-JAX reference matching the PyTorch forward."""
  h = x @ w1 + b1
  h = 1.0 / (1.0 + jnp.exp(-h))
  return h @ w2 + b2


if __name__ == "__main__":
  key = jax.random.PRNGKey(0)
  kx, k1, k2, k3, k4 = jax.random.split(key, 5)

  B, IN, HID, OUT = 8, 2, 4, 1
  x = jax.random.normal(kx, (B, IN), jnp.float32)

  # nn.Linear default init: U(-1/sqrt(fan_in), 1/sqrt(fan_in)).
  bnd1 = 1.0 / (IN ** 0.5)
  w1 = jax.random.uniform(k1, (IN, HID), jnp.float32, -bnd1, bnd1)
  b1 = jax.random.uniform(k2, (HID,), jnp.float32, -bnd1, bnd1)
  bnd2 = 1.0 / (HID ** 0.5)
  w2 = jax.random.uniform(k3, (HID, OUT), jnp.float32, -bnd2, bnd2)
  b2 = jax.random.uniform(k4, (OUT,), jnp.float32, -bnd2, bnd2)

  slab = pack_params(w1, b1, w2, b2)
  out = jax.block_until_ready(
      sigmoid_lr(x, slab, in_features=IN, hidden_dim=HID, out_features=OUT))
  ref = reference(x, w1, b1, w2, b2)

  ok = (out.shape == (B, OUT)) and bool(
      jnp.allclose(out, ref, atol=1e-5, rtol=1e-5))
  if ok:
    print("KERNEL_OK")
</pallas_src>

<mosaic_0001>
module attributes {stable_mosaic.version = 11 : i64} {
  func.func @_sigmoid_lr_kernel(%arg0: i32, %arg1: memref<8x128xf32, #tpu.memory_space<vmem>>, %arg2: memref<8x128xf32, #tpu.memory_space<vmem>>, %arg3: memref<8x128xf32, #tpu.memory_space<vmem>>) attributes {dimension_semantics = [#tpu.dimension_semantics<parallel>], iteration_bounds = array<i64: 1>, scalar_prefetch = 0 : i64, scratch_operands = 0 : i64, tpu.core_type = #tpu.core_type<tc>, window_params = [{transform_indices = @transform_0, window_bounds = array<i64: 8, 128>}, {pipeline_mode = #tpu.pipeline_mode<synchronous>, transform_indices = @transform_1, window_bounds = array<i64: 8, 128>}, {transform_indices = @transform_2, window_bounds = array<i64: 8, 128>}]} {
    %c0 = arith.constant 0 : index
    %c0_0 = arith.constant 0 : index
    %0 = vector.load %arg1[%c0, %c0_0] : memref<8x128xf32, #tpu.memory_space<vmem>>, vector<8x128xf32>
    %1 = vector.extract_strided_slice %0 {offsets = [0, 0], sizes = [8, 1], strides = [1, 1]} : vector<8x128xf32> to vector<8x1xf32>
    %c0_1 = arith.constant 0 : index
    %c0_2 = arith.constant 0 : index
    %2 = vector.load %arg2[%c0_1, %c0_2] : memref<8x128xf32, #tpu.memory_space<vmem>>, vector<1x128xf32>
    %3 = vector.broadcast %1 : vector<8x1xf32> to vector<8x128xf32>
    %4 = vector.broadcast %2 : vector<1x128xf32> to vector<8x128xf32>
    %5 = arith.mulf %3, %4 : vector<8x128xf32>
    %c2 = arith.constant 2 : index
    %c0_3 = arith.constant 0 : index
    %6 = vector.load %arg2[%c2, %c0_3] : memref<8x128xf32, #tpu.memory_space<vmem>>, vector<1x128xf32>
    %7 = vector.broadcast %6 : vector<1x128xf32> to vector<8x128xf32>
    %8 = arith.addf %5, %7 : vector<8x128xf32>
    %9 = vector.extract_strided_slice %0 {offsets = [0, 1], sizes = [8, 1], strides = [1, 1]} : vector<8x128xf32> to vector<8x1xf32>
    %c1 = arith.constant 1 : index
    %c0_4 = arith.constant 0 : index
    %10 = vector.load %arg2[%c1, %c0_4] : memref<8x128xf32, #tpu.memory_space<vmem>>, vector<1x128xf32>
    %11 = vector.broadcast %9 : vector<8x1xf32> to vector<8x128xf32>
    %12 = vector.broadcast %10 : vector<1x128xf32> to vector<8x128xf32>
    %13 = arith.mulf %11, %12 : vector<8x128xf32>
    %14 = arith.addf %8, %13 : vector<8x128xf32>
    %cst = arith.constant 0.000000e+00 : f32
    %15 = vector.broadcast %cst : f32 to vector<8x128xf32>
    %16 = arith.subf %15, %14 : vector<8x128xf32>
    %17 = math.exp %16 : vector<8x128xf32>
    %cst_5 = arith.constant 1.000000e+00 : f32
    %18 = vector.broadcast %cst_5 : f32 to vector<8x128xf32>
    %19 = arith.addf %18, %17 : vector<8x128xf32>
    %cst_6 = arith.constant 1.000000e+00 : f32
    %20 = vector.broadcast %cst_6 : f32 to vector<8x128xf32>
    %21 = arith.divf %20, %19 : vector<8x128xf32>
    %22 = vector.extract_strided_slice %21 {offsets = [0, 0], sizes = [8, 1], strides = [1, 1]} : vector<8x128xf32> to vector<8x1xf32>
    %c3 = arith.constant 3 : index
    %c0_7 = arith.constant 0 : index
    %23 = vector.load %arg2[%c3, %c0_7] : memref<8x128xf32, #tpu.memory_space<vmem>>, vector<1x128xf32>
    %24 = vector.broadcast %22 : vector<8x1xf32> to vector<8x128xf32>
    %25 = vector.broadcast %23 : vector<1x128xf32> to vector<8x128xf32>
    %26 = arith.mulf %24, %25 : vector<8x128xf32>
    %c7 = arith.constant 7 : index
    %c0_8 = arith.constant 0 : index
    %27 = vector.load %arg2[%c7, %c0_8] : memref<8x128xf32, #tpu.memory_space<vmem>>, vector<1x128xf32>
    %28 = vector.broadcast %27 : vector<1x128xf32> to vector<8x128xf32>
    %29 = arith.addf %26, %28 : vector<8x128xf32>
    %30 = vector.extract_strided_slice %21 {offsets = [0, 1], sizes = [8, 1], strides = [1, 1]} : vector<8x128xf32> to vector<8x1xf32>
    %c4 = arith.constant 4 : index
    %c0_9 = arith.constant 0 : index
    %31 = vector.load %arg2[%c4, %c0_9] : memref<8x128xf32, #tpu.memory_space<vmem>>, vector<1x128xf32>
    %32 = vector.broadcast %30 : vector<8x1xf32> to vector<8x128xf32>
    %33 = vector.broadcast %31 : vector<1x128xf32> to vector<8x128xf32>
    %34 = arith.mulf %32, %33 : vector<8x128xf32>
    %35 = arith.addf %29, %34 : vector<8x128xf32>
    %36 = vector.extract_strided_slice %21 {offsets = [0, 2], sizes = [8, 1], strides = [1, 1]} : vector<8x128xf32> to vector<8x1xf32>
    %c5 = arith.constant 5 : index
    %c0_10 = arith.constant 0 : index
    %37 = vector.load %arg2[%c5, %c0_10] : memref<8x128xf32, #tpu.memory_space<vmem>>, vector<1x128xf32>
    %38 = vector.broadcast %36 : vector<8x1xf32> to vector<8x128xf32>
    %39 = vector.broadcast %37 : vector<1x128xf32> to vector<8x128xf32>
    %40 = arith.mulf %38, %39 : vector<8x128xf32>
    %41 = arith.addf %35, %40 : vector<8x128xf32>
    %42 = vector.extract_strided_slice %21 {offsets = [0, 3], sizes = [8, 1], strides = [1, 1]} : vector<8x128xf32> to vector<8x1xf32>
    %c6 = arith.constant 6 : index
    %c0_11 = arith.constant 0 : index
    %43 = vector.load %arg2[%c6, %c0_11] : memref<8x128xf32, #tpu.memory_space<vmem>>, vector<1x128xf32>
    %44 = vector.broadcast %42 : vector<8x1xf32> to vector<8x128xf32>
    %45 = vector.broadcast %43 : vector<1x128xf32> to vector<8x128xf32>
    %46 = arith.mulf %44, %45 : vector<8x128xf32>
    %47 = arith.addf %41, %46 : vector<8x128xf32>
    %c0_12 = arith.constant 0 : index
    %c0_13 = arith.constant 0 : index
    %48 = vector.load %arg3[%c0_12, %c0_13] : memref<8x128xf32, #tpu.memory_space<vmem>>, vector<8x128xf32>
    tpu.vector_store %arg3[%c0_12, %c0_13], %47 {strides = array<i32>} : memref<8x128xf32, #tpu.memory_space<vmem>>, vector<8x128xf32>,
    return
  }
  func.func @transform_0(%arg0: i32) -> (i32, i32) {
    %c0_i32 = arith.constant 0 : i32
    %c0_i32_0 = arith.constant 0 : i32
    return %arg0, %c0_i32 : i32, i32
  }
  func.func @transform_1(%arg0: i32) -> (i32, i32) {
    %c0_i32 = arith.constant 0 : i32
    %c0_i32_0 = arith.constant 0 : i32
    %c0_i32_1 = arith.constant 0 : i32
    return %c0_i32, %c0_i32_0 : i32, i32
  }
  func.func @transform_2(%arg0: i32) -> (i32, i32) {
    %c0_i32 = arith.constant 0 : i32
    %c0_i32_0 = arith.constant 0 : i32
    return %arg0, %c0_i32 : i32, i32
  }
}

</mosaic_0001>

<bundles_post_ra>
// kernel: tpu_custom_call.1
= control target key start
LH: loop header
LB: loop body
LE: loop exit
PB: predicated region body
PF: predicated region fallthrough
CT: control target
= control target key end

     0   :  { %7 = vsyncpa [#allocation3], 0  ;;  %s293_s0 = inlined_call_operand.hbm [shape: f32[8,128], index: 0, kind: input, shape index: {}]   ;;  %s294_s1 = inlined_call_operand.hbm [shape: f32[8,128], index: 1, kind: input, shape index: {}]   ;;  %s295_s2 = inlined_call_operand.hbm [shape: f32[8,128], index: 2, kind: output, shape index: {}]  }
   0x1   :  { %8 = vsyncpa [#allocation6], 0 }
   0x2   :  { %9 = vsyncpa [#allocation4], 0  ;;  %s235_s9 = smov [#allocation2]   ;;  %s236_s11 = smov [#allocation5]  }
   0x3   :  { %s16_s10 = sshll.u32 %s235_s9, 4  ;;  %s26_s12 = sshll.u32 %s236_s11, 4  ;;  %s17_s10 = int_to_ptr.vmem [resolvable:$true] %s16_s10  ;;  %s27_s12 = int_to_ptr.vmem [resolvable:$true] %s26_s12 }
   0x4   :  { %s163_s15 = scalar_lea.hbm %s293_s0, 128 }
   0x5   :  { %p164_p0 = scmp.ne.s32.totalorder %s293_s0, %s163_s15  ;;  %p167_p1 = scmp.lt.u32.totalorder %s163_s15, %s293_s0 }
   0x7   :  { %p169_p2 = pnand %p167_p1, %p164_p0 }
   0x9   :  { %172 = shalt.err (!%p169_p2)
}
   0xa   :  { %s173_s20 = scalar_lea.vmem %s17_s10, 128  ;;  %p178_p4 = scmp.lt.s32.totalorder %s17_s10, %s17_s10 }
   0xb   :  { %p174_p3 = scmp.ne.s32.totalorder %s17_s10, %s173_s20  ;;  %p179_p5 = scmp.lt.s32.totalorder %s173_s20, %s173_s20 }
   0xd   :  { %p180_p6 = por %p179_p5, %p178_p4 }
   0xf   :  { %p181_p7 = pnand %p180_p6, %p174_p3 }
  0x11   :  { %184 = shalt.err (!%p181_p7)
}
  0x12   :  { %19 = dma.hbm_to_vmem [thread:$0]  %s293_s0, 128, %s17_s10, [#allocation3]  }
  0x13   :  { %s185_s25 = scalar_lea.hbm %s294_s1, 128 }
  0x14   :  { %p186_p8 = scmp.ne.s32.totalorder %s294_s1, %s185_s25  ;;  %p189_p9 = scmp.lt.u32.totalorder %s185_s25, %s294_s1 }
  0x16   :  { %p191_p10 = pnand %p189_p9, %p186_p8 }
  0x18   :  { %194 = shalt.err (!%p191_p10)
}
  0x19   :  { %s195_s30 = scalar_lea.vmem %s27_s12, 128  ;;  %p200_p12 = scmp.lt.s32.totalorder %s27_s12, %s27_s12 }
  0x1a   :  { %p196_p11 = scmp.ne.s32.totalorder %s27_s12, %s195_s30  ;;  %p201_p13 = scmp.lt.s32.totalorder %s195_s30, %s195_s30 }
  0x1c   :  { %p202_p0 = por %p201_p13, %p200_p12 }
  0x1e   :  { %p203_p1 = pnand %p202_p0, %p196_p11 }
  0x20   :  { %206 = shalt.err (!%p203_p1)
}
  0x21   :  { %29 = dma.hbm_to_vmem [thread:$0]  %s294_s1, 128, %s27_s12, [#allocation6]  }
  0x22   :  { %229 = dma.done.wait [#allocation3], 128  }
  0x23   :  { %230 = vsyncadd [#allocation3], 4294967168 }
  0x24   :  { %231 = dma.done.wait [#allocation6], 128  }
  0x25   :  { %232 = vsyncadd [#allocation6], 4294967168  ;;  %v237_v0 = vmov 0   ;;  %v36_v1 = vld [vmem:[#allocation2] sm:$0xff]  ;;  %v238_v2 = vmov 1   ;;  %v239_v3 = vmov 3  }
  0x26   :  { %153 = vset.pattern.permute.xlu0 %v237_v0  ;;  %155 = vset.pattern.permute.xlu1 %v237_v0  ;;  %v138_v4 = vld [vmem:[#allocation5] ss:$0 sm:$0xff]  ;;  %v139_v7 = vld [vmem:[#allocation5 + $0x2] ss:$0 sm:$0xff]  ;;  %v140_v8 = vld [vmem:[#allocation5 + $0x1] ss:$0 sm:$0xff] }
  0x27   :  { %40 = vperm.xlu0 %153, %v36_v1   ;;  %v240_v18 = vmov 2   ;;  %v141_v20 = vld [vmem:[#allocation5 + $0x3] ss:$0 sm:$0xff]  ;;  %v143_v21 = vld [vmem:[#allocation5 + $0x4] ss:$0 sm:$0xff]  ;;  %s241_s1 = smov [#allocation7]  }
  0x28   :  { %v142_v24 = vld [vmem:[#allocation5 + $0x7] ss:$0 sm:$0xff]  ;;  %v144_v26 = vld [vmem:[#allocation5 + $0x5] ss:$0 sm:$0xff]  ;;  %v145_v28 = vld [vmem:[#allocation5 + $0x6] ss:$0 sm:$0xff] }
  0x29   :  { %s128_s4 = sshll.u32 %s241_s1, 4  ;;  %s129_s4 = int_to_ptr.vmem [resolvable:$true] %s128_s4 }
  0x2a   :  { %s207_s5 = scalar_lea.vmem %s129_s4, 128  ;;  %p212_p3 = scmp.lt.s32.totalorder %s129_s4, %s129_s4 }
  0x2b   :  { %154 = vset.pattern.permute.xlu0 %v238_v2  ;;  %p208_p2 = scmp.ne.s32.totalorder %s129_s4, %s207_s5  ;;  %p213_p4 = scmp.lt.s32.totalorder %s207_s5, %s207_s5 }
  0x2c   :  { %56 = vperm.xlu0 %154, %v36_v1  }
  0x2d   :  { %p214_p5 = por %p213_p4, %p212_p3 }
  0x2f   :  { %p215_p6 = pnand %p214_p5, %p208_p2 }
  0x30   :  { %158 = vset.pattern.permute.xlu0 %v239_v3 }
  0xa6   :  { %v41_v5 = vpop.permute.xlu0 %40 }
  0xa7   :  { %v47_v6 = vmul.f32 %v138_v4, %v41_v5 }
  0xa9   :  { %v53_v10 = vadd.f32 %v139_v7, %v47_v6 }
  0xab   :  { %v57_v9 = vpop.permute.xlu0 %56 }
  0xac   :  { %v63_v11 = vmul.f32 %v140_v8, %v57_v9 }
  0xae   :  { %v64_v12 = vadd.f32 %v63_v11, %v53_v10 }
  0xb0   :  { %v65_v13 = vsub.f32 0.0, %v64_v12 }
  0xb2   :  { %v66_v14 = vmul.f32 1.442695, %v65_v13 }
  0xb4   :  { %159 = vpow2.f32 %v66_v14 }
  0xbe   :  { %v160_v15 = vpop.eup %159 }
  0xbf   :  { %v68_v16 = vadd.f32 1.0, %v160_v15 }
  0xc1   :  { %161 = vrcp.f32 %v68_v16 }
  0xcb   :  { %v162_v17 = vpop.eup %161 }
  0xcc   :  { %112 = vperm.xlu0 %158, %v162_v17   ;;  %74 = vperm.xlu1 %155, %v162_v17  }
  0xd0   :  { %156 = vset.pattern.permute.xlu1 %v238_v2 }
  0xd1   :  { %90 = vperm.xlu1 %156, %v162_v17  }
  0xd5   :  { %157 = vset.pattern.permute.xlu1 %v240_v18 }
  0xd6   :  { %101 = vperm.xlu1 %157, %v162_v17  }
 0x14b   :  { %v75_v19 = vpop.permute.xlu1 %74  ;;  %v113_v29 = vpop.permute.xlu0 %112 }
 0x14c   :  { %v81_v22 = vmul.f32 %v141_v20, %v75_v19  ;;  %v119_v33 = vmul.f32 %v145_v28, %v113_v29 }
 0x14e   :  { %v87_v27 = vadd.f32 %v142_v24, %v81_v22 }
 0x150   :  { %v91_v23 = vpop.permute.xlu1 %90 }
 0x151   :  { %v97_v25 = vmul.f32 %v143_v21, %v91_v23 }
 0x153   :  { %v98_v31 = vadd.f32 %v97_v25, %v87_v27 }
 0x155   :  { %v102_v30 = vpop.permute.xlu1 %101 }
 0x156   :  { %v108_v32 = vmul.f32 %v144_v26, %v102_v30 }
 0x158   :  { %v109_v34 = vadd.f32 %v108_v32, %v98_v31 }
 0x15a   :  { %v120_v35 = vadd.f32 %v119_v33, %v109_v34 }
 0x15c   :  { %121 = vst [vmem:[#allocation7] sm:$0xff] %v120_v35 }
 0x15d   :  { %218 = shalt.err (!%p215_p6)
}
 0x15e   :  { %s219_s8 = scalar_lea.hbm %s295_s2, 128 }
 0x15f   :  { %p220_p7 = scmp.ne.s32.totalorder %s295_s2, %s219_s8  ;;  %p223_p8 = scmp.lt.u32.totalorder %s219_s8, %s295_s2 }
 0x161   :  { %p225_p9 = pnand %p223_p8, %p220_p7 }
 0x163   :  { %228 = shalt.err (!%p225_p9)
}
 0x164   :  { %131 = dma.vmem_to_hbm [thread:$0]  %s129_s4, 128, %s295_s2, [#allocation4]  }
 0x165   :  { %233 = dma.done.wait [#allocation4], 128  }
 0x166   :  { %234 = vsyncadd [#allocation4], 4294967168 }
 0x167   :  { %135 = vsyncpa [#allocation3], 1 }
 0x168   :  { %136 = vsyncpa [#allocation6], 1 }
 0x169   :  { %137 = vsyncpa [#allocation4], 1 }

</bundles_post_ra>
